<compile_context>
chip_gen: v6e
topology: v6e:2x2x1
jax: 0.10.0
libtpu: 0.0.40
codegen_flags: <defaults>
</compile_context>

<pallas_src>
import functools

import jax
import jax.numpy as jnp
from jax.experimental import pallas as pl
from jax.experimental.pallas import tpu as pltpu


def _round_up(x, m):
    return ((x + m - 1) // m) * m


def _down_conv_kernel(lhs_ref, w_ref, b_ref, o_ref, *, tm, owp_a, align):
    """One (image, M-row-block, Cout-tile) block of the 4x4 / stride-2 conv.

    lhs_ref : (R, 8*Cinp)      phase+kw-shift folded rows for one image (compute dtype)
    w_ref   : (2, 8*Cinp, tn)  folded weights, leading dim = kh // 2
    b_ref   : (1, tn)          bias (f32)
    o_ref   : (tm, tn)         output row block
    """
    m = pl.program_id(2)                           # M-row-block axis (innermost in both orders)
    r0 = pl.multiple_of(m * tm, align)             # kh//2 == 0 window (aligned -> free view)
    r1 = pl.multiple_of(m * tm + owp_a, align)     # kh//2 == 1 window
    acc = jnp.dot(lhs_ref[pl.ds(r0, tm), :], w_ref[0],
                  preferred_element_type=jnp.float32)
    acc = acc + jnp.dot(lhs_ref[pl.ds(r1, tm), :], w_ref[1],
                        preferred_element_type=jnp.float32)
    o_ref[...] = (acc + b_ref[...]).astype(o_ref.dtype)


def downsample(x_nchw, weight, bias, *, compute_dtype=jnp.bfloat16):
    """Equivalent of Downsample.forward: Conv2d(dim, dim, 4, stride=2, padding=1)."""
    Cout, Cin, KH, KW = weight.shape                 # PyTorch OIHW weight layout
    assert (KH, KW) == (4, 4)
    N, C, H, W = x_nchw.shape
    assert C == Cin
    assert H % 2 == 0 and W % 2 == 0, "stride-2 downsample expects even spatial dims"

    OH, OW = H // 2, W // 2
    OHp, OWp = OH + 1, OW + 1

    # Channel padding: Cin -> mult of 16 (K = 8*Cinp becomes a multiple of 128),
    # Cout -> mult of 128 (lane-dense output stores).
    Cinp = _round_up(Cin, 16)
    Coutp = _round_up(Cout, 128)
    K8 = 8 * Cinp
    tn = 128
    J = Coutp // tn

    # Row pitch padded to the sublane pack of the compute dtype -> aligned tap windows.
    sub = 16 if jnp.dtype(compute_dtype).itemsize == 2 else 8
    OWp_a = _round_up(OWp, sub)
    M_out = OH * OWp_a                               # output rows incl. junk columns
    nb = -(-M_out // 256)                            # number of M row blocks (~<=256 rows each)
    TM = _round_up(-(-M_out // nb), sub)
    M_pad = nb * TM
    R = M_pad + OWp_a                                # LHS rows the kernel may touch

    # ---- host-side layout glue (~2x input bytes; no 4x im2col) -----------------------
    x = jnp.transpose(x_nchw, (0, 2, 3, 1))                       # NCHW -> NHWC
    if Cinp != Cin:
        x = jnp.pad(x, ((0, 0), (0, 0), (0, 0), (0, Cinp - Cin)))
    xp = jnp.pad(x, ((0, 0), (1, 1), (1, 1), (0, 0)))             # (N, 2*OHp, 2*OWp, Cinp)
    ph = (xp.reshape(N, OHp, 2, OWp, 2, Cinp)                     # [n, i, pi, j, pj, c]
            .transpose(0, 1, 3, 2, 4, 5)                          # [n, i, j, pi, pj, c]
            .reshape(N, OHp, OWp, 4 * Cinp))                      # chan = (2*pi+pj)*Cinp + c
    ph = jnp.pad(ph, ((0, 0), (0, 0), (0, OWp_a - OWp), (0, 0)))
    flat = ph.reshape(N, OHp * OWp_a, 4 * Cinp)
    flat = jnp.pad(flat, ((0, 0), (0, R + 1 - OHp * OWp_a), (0, 0)))
    # Fold kw parity (b) into channels: K index = b*4*Cinp + (2*pi+pj)*Cinp + c.
    lhs = jnp.concatenate([flat[:, :R, :], flat[:, 1:R + 1, :]], axis=-1)
    lhs = lhs.astype(compute_dtype)                               # (N, R, 8*Cinp)

    # Weights OIHW -> (kh//2, K = 8*Cinp, Coutp) matching the LHS channel layout.
    w = jnp.transpose(weight, (2, 3, 1, 0))                       # (KH, KW, Cin, Cout)
    w = jnp.pad(w, ((0, 0), (0, 0), (0, Cinp - Cin), (0, Coutp - Cout)))
    w = (w.reshape(2, 2, 2, 2, Cinp, Coutp)                       # (a, pi, b, pj, c, o)
          .transpose(0, 2, 1, 3, 4, 5)                            # (a, b, pi, pj, c, o)
          .reshape(2, K8, Coutp)
          .astype(compute_dtype))
    bias2d = jnp.pad(bias, (0, Coutp - Cout)).reshape(1, Coutp).astype(jnp.float32)

    out_dtype = x_nchw.dtype

    # ---- grid order: keep the larger operand resident on the outer axes --------------
    lhs_bytes = lhs.size * lhs.dtype.itemsize
    w_bytes = w.size * w.dtype.itemsize
    weight_resident = w_bytes * (N - 1) > lhs_bytes * (J - 1)
    if weight_resident:                      # Cout-tile outermost: weight fetched once
        grid = (J, N, nb)
        lhs_spec = pl.BlockSpec((None, R, K8), lambda j, n, m: (n, 0, 0))
        w_spec = pl.BlockSpec((2, K8, tn), lambda j, n, m: (0, 0, j))
        b_spec = pl.BlockSpec((1, tn), lambda j, n, m: (0, j))
        o_spec = pl.BlockSpec((None, TM, tn), lambda j, n, m: (n, m, j))
    else:                                    # image outermost: phase planes fetched once
        grid = (N, J, nb)
        lhs_spec = pl.BlockSpec((None, R, K8), lambda n, j, m: (n, 0, 0))
        w_spec = pl.BlockSpec((2, K8, tn), lambda n, j, m: (0, 0, j))
        b_spec = pl.BlockSpec((1, tn), lambda n, j, m: (0, j))
        o_spec = pl.BlockSpec((None, TM, tn), lambda n, j, m: (n, m, j))

    # VMEM budget: double-buffered blocks + headroom; stays v7x (64 MiB) friendly for
    # realistic Downsample shapes.
    blk_bytes = 2 * (R * K8 * lhs.dtype.itemsize
                     + 2 * K8 * tn * w.dtype.itemsize
                     + TM * tn * jnp.dtype(out_dtype).itemsize
                     + tn * 4)
    vmem_limit = int(min(max(blk_bytes + (8 << 20), 32 << 20), 96 << 20))
    # TODO(synk): for very large spatial inputs (H,W >= 256 with Cin >= 128) add a
    # halo-tiled spatial grid axis so whole-image planes need not be VMEM-resident (v7x).

    flops = 2 * (N * M_pad) * Coutp * (2 * K8)
    bytes_accessed = (lhs_bytes + w_bytes + bias2d.size * 4
                      + N * M_pad * Coutp * jnp.dtype(out_dtype).itemsize)

    out = pl.pallas_call(
        functools.partial(_down_conv_kernel, tm=TM, owp_a=OWp_a, align=sub),
        out_shape=jax.ShapeDtypeStruct((N, M_pad, Coutp), out_dtype),
        grid_spec=pltpu.PrefetchScalarGridSpec(
            num_scalar_prefetch=0,
            grid=grid,
            in_specs=[lhs_spec, w_spec, b_spec],
            out_specs=o_spec,
        ),
        compiler_params=pltpu.CompilerParams(
            dimension_semantics=("parallel", "parallel", "parallel"),
            vmem_limit_bytes=vmem_limit,
        ),
        cost_estimate=pl.CostEstimate(
            flops=flops, transcendentals=0, bytes_accessed=bytes_accessed),
    )(lhs, w, bias2d)

    # Drop junk rows/columns and channel padding; back to NCHW.
    out = out[:, :M_out, :Cout].reshape(N, OH, OWp_a, Cout)[:, :, :OW, :]
    return jnp.transpose(out, (0, 3, 1, 2))


if __name__ == "__main__":
    dim = 4
    N, H, W = 2, 16, 16

    key = jax.random.PRNGKey(0)
    kx, kw, kb = jax.random.split(key, 3)

    x = jax.random.normal(kx, (N, dim, H, W), dtype=jnp.float32)
    # Deterministic synthetic Conv2d params (OIHW), kaiming-ish scale 1/sqrt(fan_in).
    fan_in = dim * 4 * 4
    weight = jax.random.normal(kw, (dim, dim, 4, 4), dtype=jnp.float32) / jnp.sqrt(fan_in)
    bias = jax.random.normal(kb, (dim,), dtype=jnp.float32) * 0.1

    y = jax.jit(downsample)(x, weight, bias)
    y = jax.block_until_ready(y)
    assert y.shape == (N, dim, H // 2, W // 2), y.shape

    # Cross-check against XLA's conv (f32 reference; bf16 MXU inputs -> loose tolerance).
    ref = jax.lax.conv_general_dilated(
        x, weight, window_strides=(2, 2), padding=((1, 1), (1, 1)),
        dimension_numbers=("NCHW", "OIHW", "NCHW")) + bias.reshape(1, -1, 1, 1)
    assert jnp.allclose(y, ref, atol=5e-2, rtol=5e-2), float(jnp.max(jnp.abs(y - ref)))

    print("KERNEL_OK")
</pallas_src>

<mosaic_0001>
module attributes {stable_mosaic.version = 11 : i64} {
  func.func @_down_conv_kernel(%arg0: i32, %arg1: i32, %arg2: i32, %arg3: memref<1x144x128xbf16, #tpu.memory_space<vmem>>, %arg4: memref<2x128x128xbf16, #tpu.memory_space<vmem>>, %arg5: memref<1x128xf32, #tpu.memory_space<vmem>>, %arg6: memref<1x128x128xf32, #tpu.memory_space<vmem>>) attributes {dimension_semantics = [#tpu.dimension_semantics<parallel>, #tpu.dimension_semantics<parallel>, #tpu.dimension_semantics<parallel>], iteration_bounds = array<i64: 1, 2, 1>, scalar_prefetch = 0 : i64, scratch_operands = 0 : i64, tpu.core_type = #tpu.core_type<tc>, window_params = [{transform_indices = @transform_0, window_bounds = array<i64: 1, 144, 128>}, {transform_indices = @transform_1, window_bounds = array<i64: 2, 128, 128>}, {transform_indices = @transform_2, window_bounds = array<i64: 1, 128>}, {transform_indices = @transform_3, window_bounds = array<i64: 1, 128, 128>}]} {
    %c128_i32 = arith.constant 128 : i32
    %0 = arith.muli %arg2, %c128_i32 : i32
    %1 = tpu.assume_multiple %0, 16 : i32
    %c128_i32_0 = arith.constant 128 : i32
    %2 = arith.muli %arg2, %c128_i32_0 : i32
    %c16_i32 = arith.constant 16 : i32
    %3 = arith.addi %2, %c16_i32 : i32
    %4 = tpu.assume_multiple %3, 16 : i32
    %c0 = arith.constant 0 : index
    %5 = arith.index_cast %1 : i32 to index
    %c0_1 = arith.constant 0 : index
    %6 = vector.load %arg3[%c0, %5, %c0_1] : memref<1x144x128xbf16, #tpu.memory_space<vmem>>, vector<1x128x128xbf16>
    %7 = vector.shape_cast %6 : vector<1x128x128xbf16> to vector<128x128xbf16>
    %c0_2 = arith.constant 0 : index
    %c0_3 = arith.constant 0 : index
    %c0_4 = arith.constant 0 : index
    %8 = vector.load %arg4[%c0_2, %c0_3, %c0_4] : memref<2x128x128xbf16, #tpu.memory_space<vmem>>, vector<1x128x128xbf16>
    %9 = vector.shape_cast %8 : vector<1x128x128xbf16> to vector<128x128xbf16>
    %cst = arith.constant dense<0.000000e+00> : vector<128x128xf32>
    %10 = tpu.matmul %7, %9, %cst {dimension_numbers = #tpu.dot_dimension_numbers<[1], [0], [0], [1], [0, 0, 1, 1], [], []>} : vector<128x128xbf16>, vector<128x128xbf16>, vector<128x128xf32> -> vector<128x128xf32>
    %c0_5 = arith.constant 0 : index
    %11 = arith.index_cast %4 : i32 to index
    %c0_6 = arith.constant 0 : index
    %12 = vector.load %arg3[%c0_5, %11, %c0_6] : memref<1x144x128xbf16, #tpu.memory_space<vmem>>, vector<1x128x128xbf16>
    %13 = vector.shape_cast %12 : vector<1x128x128xbf16> to vector<128x128xbf16>
    %c1 = arith.constant 1 : index
    %c0_7 = arith.constant 0 : index
    %c0_8 = arith.constant 0 : index
    %14 = vector.load %arg4[%c1, %c0_7, %c0_8] : memref<2x128x128xbf16, #tpu.memory_space<vmem>>, vector<1x128x128xbf16>
    %15 = vector.shape_cast %14 : vector<1x128x128xbf16> to vector<128x128xbf16>
    %cst_9 = arith.constant dense<0.000000e+00> : vector<128x128xf32>
    %16 = tpu.matmul %13, %15, %cst_9 {dimension_numbers = #tpu.dot_dimension_numbers<[1], [0], [0], [1], [0, 0, 1, 1], [], []>} : vector<128x128xbf16>, vector<128x128xbf16>, vector<128x128xf32> -> vector<128x128xf32>
    %17 = arith.addf %10, %16 : vector<128x128xf32>
    %c0_10 = arith.constant 0 : index
    %c0_11 = arith.constant 0 : index
    %18 = vector.load %arg5[%c0_10, %c0_11] : memref<1x128xf32, #tpu.memory_space<vmem>>, vector<1x128xf32>
    %19 = vector.broadcast %18 : vector<1x128xf32> to vector<128x128xf32>
    %20 = arith.addf %17, %19 : vector<128x128xf32>
    %c0_12 = arith.constant 0 : index
    %c0_13 = arith.constant 0 : index
    %c0_14 = arith.constant 0 : index
    %21 = vector.load %arg6[%c0_12, %c0_13, %c0_14] : memref<1x128x128xf32, #tpu.memory_space<vmem>>, vector<1x128x128xf32>
    %22 = vector.shape_cast %21 : vector<1x128x128xf32> to vector<128x128xf32>
    %23 = vector.shape_cast %20 : vector<128x128xf32> to vector<1x128x128xf32>
    tpu.vector_store %arg6[%c0_12, %c0_13, %c0_14], %23 {strides = array<i32>} : memref<1x128x128xf32, #tpu.memory_space<vmem>>, vector<1x128x128xf32>,
    return
  }
  func.func @transform_0(%arg0: i32, %arg1: i32, %arg2: i32) -> (i32, i32, i32) {
    %c0_i32 = arith.constant 0 : i32
    %c0_i32_0 = arith.constant 0 : i32
    %c0_i32_1 = arith.constant 0 : i32
    return %arg1, %c0_i32, %c0_i32_0 : i32, i32, i32
  }
  func.func @transform_1(%arg0: i32, %arg1: i32, %arg2: i32) -> (i32, i32, i32) {
    %c0_i32 = arith.constant 0 : i32
    %c0_i32_0 = arith.constant 0 : i32
    %c0_i32_1 = arith.constant 0 : i32
    return %c0_i32, %c0_i32_0, %arg0 : i32, i32, i32
  }
  func.func @transform_2(%arg0: i32, %arg1: i32, %arg2: i32) -> (i32, i32) {
    %c0_i32 = arith.constant 0 : i32
    %c0_i32_0 = arith.constant 0 : i32
    return %c0_i32, %arg0 : i32, i32
  }
  func.func @transform_3(%arg0: i32, %arg1: i32, %arg2: i32) -> (i32, i32, i32) {
    %c0_i32 = arith.constant 0 : i32
    return %arg1, %arg2, %arg0 : i32, i32, i32
  }
}

</mosaic_0001>

<bundles_post_ra>
// kernel: downsample.1
= control target key start
LH: loop header
LB: loop body
LE: loop exit
PB: predicated region body
PF: predicated region fallthrough
CT: control target
= control target key end

     0   :  { %s1141_s12 = smov 0   ;;  %s1143_s13 = smov 0   ;;  %s1283_s0 = inlined_call_operand.vmem [shape: bf16[2,144,128], index: 0, kind: input, shape index: {}]   ;;  %s1284_s1 = inlined_call_operand.vmem [shape: bf16[2,128,128], index: 1, kind: input, shape index: {}]   ;;  %s1285_s2 = inlined_call_operand.vmem [shape: f32[1,128], index: 2, kind: input, shape index: {}]   ;;  %s1286_s3 = inlined_call_operand.vmem [shape: f32[2,128,128], index: 3, kind: output, shape index: {}]  }
   0x1   :  { %s1145_s14 = smov 0  }
   0x2 LB: > { %s28_s15 = sadd.s32 1, %s1115_s13  ;;  %p872_p0 = scmp.ge.s32.totalorder %s1119_s14, 1  ;;  %s1119_s14 = sphi %s1145_s14, %s13_s14   ;;  %s1115_s13 = sphi %s1143_s13, %s1288_s13   ;;  %s1111_s12 = sphi %s1141_s12, %s1287_s12  }
   0x3   : > { %p30_p1 = scmp.ge.s32.totalorder %s28_s15, 2  ;;  %p177_p2 = scmp.lt.s32.totalorder %s1119_s14, 3 }
   0x5   : > { %s1290_s15 = smov (%p30_p1, %s28_s15), 0  ;;  %p178_p3 = pnand %p872_p0, %p177_p2 }
   0x6   : > { %p215_p4 = scmp.lt.s32.totalorder (!%p178_p3), %s1111_s12, 1 }
   0x7   : > { %181 = sbr.rel (%p178_p3) target bundleno = 274 (0x112), region = 32 }
   0xc   : > { %v1065_v0 = vld [vmem:[%s1284_s1 + $0x78] sm:$0xff]   ;;  %v1067_v2 = vld [vmem:[%s1284_s1 + $0x70] sm:$0xff]   ;;  %v1069_v4 = vld [vmem:[%s1284_s1 + $0x68] sm:$0xff]   ;;  %s1292_s12 = smov (!%p215_p4, %s1111_s12), 1 }
   0xd   : > { %v1066_v1 = vld [vmem:[%s1284_s1 + $0x38] sm:$0xff]   ;;  %976 = vmatprep.subr.bf16.mxu0 %v1065_v0  ;;  %v1068_v3 = vld [vmem:[%s1284_s1 + $0x30] sm:$0xff]   ;;  %v1070_v5 = vld [vmem:[%s1284_s1 + $0x28] sm:$0xff]   ;;  %s1040_s5 = smul.u32 72, %s1292_s12  ;;  %s943_s29 = sshll.u32 %s1292_s12, 7 }
   0xe   : > { %1008 = vmatprep.subr.bf16.mxu1 %v1066_v1  ;;  %977 = vmatpush3.bf16.msra.mxu0 %v1065_v0  ;;  %v1071_v6 = vld [vmem:[%s1284_s1 + $0x60] sm:$0xff]   ;;  %v1073_v8 = vld [vmem:[%s1284_s1 + $0x58] sm:$0xff]   ;;  %v1075_v10 = vld [vmem:[%s1284_s1 + $0x50] sm:$0xff]   ;;  %s1240_s7 = scalar_lea.vmem %s1286_s3, %s943_s29 }
   0xf   : > { %1009 = vmatpush3.bf16.msra.mxu1 %v1066_v1  ;;  %978 = vmatprep.subr.bf16.mxu0 %v1067_v2  ;;  %v1072_v7 = vld [vmem:[%s1284_s1 + $0x20] sm:$0xff]   ;;  %v1074_v9 = vld [vmem:[%s1284_s1 + $0x18] sm:$0xff]   ;;  %s1195_s16 = scalar_lea.vmem %s1283_s0, %s1040_s5  ;;  %v1076_v11 = vld [vmem:[%s1284_s1 + $0x10] sm:$0xff]  }
  0x10   : > { %1010 = vmatprep.subr.bf16.mxu1 %v1068_v3  ;;  %v1081_v12 = vld [vmem:[%s1195_s16 + $0x8] sm:$0xff]   ;;  %v1082_v13 = vld [vmem:[%s1195_s16] sm:$0xff]   ;;  %v1083_v18 = vld [vmem:[%s1195_s16 + $0x10] sm:$0xff]  }
  0x11   : > { %992 = vmatprep.mubr.bf16.mxu0 %v1081_v12  ;;  %1024 = vmatprep.mubr.bf16.mxu1 %v1082_v13  ;;  %v1077_v14 = vld [vmem:[%s1284_s1 + $0x48] sm:$0xff]   ;;  %v1079_v16 = vld [vmem:[%s1284_s1 + $0x40] sm:$0xff]   ;;  %v1085_v20 = vld [vmem:[%s1195_s16 + $0x18] sm:$0xff]  }
  0x12   : > { %979 = vmatpush3.bf16.msra.mxu0 %v1067_v2  ;;  %v1078_v15 = vld [vmem:[%s1284_s1 + $0x8] sm:$0xff]   ;;  %v1080_v17 = vld [vmem:[%s1284_s1] sm:$0xff]   ;;  %v1086_v21 = vld [vmem:[%s1195_s16 + $0x10] sm:$0xff]  }
  0x13   : > { %1011 = vmatpush3.bf16.msra.mxu1 %v1068_v3  ;;  %980 = vmatprep.subr.bf16.mxu0 %v1069_v4  ;;  %v1084_v19 = vld [vmem:[%s1195_s16 + $0x8] sm:$0xff]   ;;  %v1087_v22 = vld [vmem:[%s1195_s16 + $0x20] sm:$0xff]   ;;  %v1088_v23 = vld [vmem:[%s1195_s16 + $0x18] sm:$0xff]  }
  0x14   : > { %1012 = vmatprep.subr.bf16.mxu1 %v1070_v5  ;;  %v1089_v24 = vld [vmem:[%s1195_s16 + $0x28] sm:$0xff]   ;;  %v1090_v25 = vld [vmem:[%s1195_s16 + $0x20] sm:$0xff]   ;;  %v1091_v26 = vld [vmem:[%s1195_s16 + $0x30] sm:$0xff]  }
  0x15   : > { %v1092_v27 = vld [vmem:[%s1195_s16 + $0x28] sm:$0xff]   ;;  %v1093_v28 = vld [vmem:[%s1195_s16 + $0x38] sm:$0xff]   ;;  %v1094_v29 = vld [vmem:[%s1195_s16 + $0x30] sm:$0xff]  }
  0x16   : > { %981 = vmatpush3.bf16.msra.mxu0 %v1069_v4  ;;  %v1095_v30 = vld [vmem:[%s1195_s16 + $0x40] sm:$0xff]   ;;  %v1096_v31 = vld [vmem:[%s1195_s16 + $0x38] sm:$0xff]  }
  0x17   : > { %1013 = vmatpush3.bf16.msra.mxu1 %v1070_v5  ;;  %982 = vmatprep.subr.bf16.mxu0 %v1071_v6  ;;  %v1235_v34 = vld [vmem:[%s1285_s2] ss:$0 sm:$0xff] }
  0x18   : > { %1014 = vmatprep.subr.bf16.mxu1 %v1072_v7 }
  0x1a   : > { %983 = vmatpush3.bf16.msra.mxu0 %v1071_v6 }
  0x1b   : > { %1015 = vmatpush3.bf16.msra.mxu1 %v1072_v7  ;;  %984 = vmatprep.subr.bf16.mxu0 %v1073_v8 }
  0x1c   : > { %1016 = vmatprep.subr.bf16.mxu1 %v1074_v9 }
  0x1e   : > { %985 = vmatpush3.bf16.msra.mxu0 %v1073_v8 }
  0x1f   : > { %1017 = vmatpush3.bf16.msra.mxu1 %v1074_v9  ;;  %986 = vmatprep.subr.bf16.mxu0 %v1075_v10 }
  0x20   : > { %1018 = vmatprep.subr.bf16.mxu1 %v1076_v11 }
  0x22   : > { %987 = vmatpush3.bf16.msra.mxu0 %v1075_v10 }
  0x23   : > { %1019 = vmatpush3.bf16.msra.mxu1 %v1076_v11  ;;  %988 = vmatprep.subr.bf16.mxu0 %v1077_v14 }
  0x24   : > { %1020 = vmatprep.subr.bf16.mxu1 %v1078_v15 }
  0x26   : > { %989 = vmatpush3.bf16.msra.mxu0 %v1077_v14 }
  0x27   : > { %1021 = vmatpush3.bf16.msra.mxu1 %v1078_v15  ;;  %990 = vmatprep.subr.bf16.mxu0 %v1079_v16 }
  0x28   : > { %1022 = vmatprep.subr.bf16.mxu1 %v1080_v17 }
  0x2a   : > { %991 = vmatpush3.bf16.msra.mxu0 %v1079_v16 }
  0x2b   : > { %1023 = vmatpush3.bf16.msra.mxu1 %v1080_v17 }
  0x2d   : > { %993 = vmatmul.mubr.bf16.vlgmr.msra.gmra.mxu0 %v1083_v18 }
  0x2e   : > { %1025 = vmatmul.mubr.bf16.vlgmr.msra.gmra.mxu1 %v1084_v19  ;;  %996 = vmatprep.mubr.bf16.mxu0 %v1085_v20 }
  0x2f   : > { %1028 = vmatprep.mubr.bf16.mxu1 %v1086_v21 }
  0x35   : > { %997 = vmatmul.mubr.bf16.gmra.mxu0 %v1087_v22 }
  0x36   : > { %1029 = vmatmul.mubr.bf16.gmra.mxu1 %v1088_v23  ;;  %1000 = vmatprep.mubr.bf16.mxu0 %v1089_v24 }
  0x37   : > { %1032 = vmatprep.mubr.bf16.mxu1 %v1090_v25 }
  0x3d   : > { %1001 = vmatmul.mubr.bf16.gmra.mxu0 %v1091_v26 }
  0x3e   : > { %1033 = vmatmul.mubr.bf16.gmra.mxu1 %v1092_v27  ;;  %1004 = vmatprep.mubr.bf16.mxu0 %v1093_v28 }
  0x3f   : > { %1036 = vmatprep.mubr.bf16.mxu1 %v1094_v29 }
  0x45   : > { %1005 = vmatmul.mubr.bf16.gmra.mxu0 %v1095_v30 }
  0x46   : > { %1037 = vmatmul.mubr.bf16.gmra.mxu1 %v1096_v31 }
  0xed   : > { %v994_v32 = vpop.f32.mrf.mxu0 }
  0xee   : > { %v1026_v33 = vpop.f32.mrf.mxu1 }
  0xef   : > { %v648_v35 = vadd.f32 %v1026_v33, %v994_v32  ;;  %v446_v36 = vpop.f32.mrf.mxu0 }
  0xf0   : > { %v639_v37 = vpop.f32.mrf.mxu1 }
  0xf1   : > { %v711_v38 = vadd.f32 %v1235_v34, %v648_v35  ;;  %v640_v39 = vadd.f32 %v639_v37, %v446_v36  ;;  %v995_v40 = vpop.f32.mrf.mxu0 }
  0xf2   : > { %v1027_v41 = vpop.f32.mrf.mxu1 }
  0xf3   : > { %727 = vst [vmem:[%s1240_s7 + $0x10] sm:$0xff] %v711_v38  ;;  %v709_v42 = vadd.f32 %v1235_v34, %v640_v39  ;;  %v651_v43 = vadd.f32 %v1027_v41, %v995_v40  ;;  %v449_v44 = vpop.f32.mrf.mxu0 }
  0xf4   : > { %v642_v45 = vpop.f32.mrf.mxu1 }
  0xf5   : > { %725 = vst [vmem:[%s1240_s7] sm:$0xff] %v709_v42  ;;  %v712_v46 = vadd.f32 %v1235_v34, %v651_v43  ;;  %v643_v47 = vadd.f32 %v642_v45, %v449_v44  ;;  %v998_v48 = vpop.f32.mrf.mxu0 }
  0xf6   : > { %v1030_v49 = vpop.f32.mrf.mxu1 }
  0xf7   : > { %728 = vst [vmem:[%s1240_s7 + $0x18] sm:$0xff] %v712_v46  ;;  %v710_v50 = vadd.f32 %v1235_v34, %v643_v47  ;;  %v664_v51 = vadd.f32 %v1030_v49, %v998_v48  ;;  %v462_v52 = vpop.f32.mrf.mxu0 }
  0xf8   : > { %v655_v53 = vpop.f32.mrf.mxu1 }
  0xf9   : > { %726 = vst [vmem:[%s1240_s7 + $0x8] sm:$0xff] %v710_v50  ;;  %v715_v54 = vadd.f32 %v1235_v34, %v664_v51  ;;  %v656_v55 = vadd.f32 %v655_v53, %v462_v52  ;;  %v999_v56 = vpop.f32.mrf.mxu0 }
  0xfa   : > { %v1031_v57 = vpop.f32.mrf.mxu1 }
  0xfb   : > { %731 = vst [vmem:[%s1240_s7 + $0x30] sm:$0xff] %v715_v54  ;;  %v713_v58 = vadd.f32 %v1235_v34, %v656_v55  ;;  %v667_v59 = vadd.f32 %v1031_v57, %v999_v56  ;;  %v465_v60 = vpop.f32.mrf.mxu0 }
  0xfc   : > { %v658_v61 = vpop.f32.mrf.mxu1 }
  0xfd   : > { %729 = vst [vmem:[%s1240_s7 + $0x20] sm:$0xff] %v713_v58  ;;  %v716_v62 = vadd.f32 %v1235_v34, %v667_v59  ;;  %v659_v63 = vadd.f32 %v658_v61, %v465_v60  ;;  %v1002_v0 = vpop.f32.mrf.mxu0 }
  0xfe   : > { %v1034_v1 = vpop.f32.mrf.mxu1 }
  0xff   : > { %732 = vst [vmem:[%s1240_s7 + $0x38] sm:$0xff] %v716_v62  ;;  %v714_v2 = vadd.f32 %v1235_v34, %v659_v63  ;;  %v680_v3 = vadd.f32 %v1034_v1, %v1002_v0  ;;  %v478_v4 = vpop.f32.mrf.mxu0 }
 0x100   : > { %v671_v5 = vpop.f32.mrf.mxu1 }
 0x101   : > { %730 = vst [vmem:[%s1240_s7 + $0x28] sm:$0xff] %v714_v2  ;;  %v719_v6 = vadd.f32 %v1235_v34, %v680_v3  ;;  %v672_v7 = vadd.f32 %v671_v5, %v478_v4  ;;  %v1003_v8 = vpop.f32.mrf.mxu0 }
 0x102   : > { %v1035_v9 = vpop.f32.mrf.mxu1 }
 0x103   : > { %735 = vst [vmem:[%s1240_s7 + $0x50] sm:$0xff] %v719_v6  ;;  %v717_v10 = vadd.f32 %v1235_v34, %v672_v7  ;;  %v683_v11 = vadd.f32 %v1035_v9, %v1003_v8  ;;  %v481_v12 = vpop.f32.mrf.mxu0 }
 0x104   : > { %v674_v13 = vpop.f32.mrf.mxu1 }
 0x105   : > { %733 = vst [vmem:[%s1240_s7 + $0x40] sm:$0xff] %v717_v10  ;;  %v720_v14 = vadd.f32 %v1235_v34, %v683_v11  ;;  %v675_v15 = vadd.f32 %v674_v13, %v481_v12  ;;  %v1006_v16 = vpop.f32.mrf.mxu0 }
 0x106   : > { %v1038_v17 = vpop.f32.mrf.mxu1 }
 0x107   : > { %736 = vst [vmem:[%s1240_s7 + $0x58] sm:$0xff] %v720_v14  ;;  %v718_v18 = vadd.f32 %v1235_v34, %v675_v15  ;;  %v696_v19 = vadd.f32 %v1038_v17, %v1006_v16  ;;  %v494_v20 = vpop.f32.mrf.mxu0 }
 0x108   : > { %v687_v21 = vpop.f32.mrf.mxu1 }
 0x109   : > { %734 = vst [vmem:[%s1240_s7 + $0x48] sm:$0xff] %v718_v18  ;;  %v723_v22 = vadd.f32 %v1235_v34, %v696_v19  ;;  %v688_v23 = vadd.f32 %v687_v21, %v494_v20  ;;  %v1007_v24 = vpop.f32.mrf.mxu0 }
 0x10a   : > { %v1039_v25 = vpop.f32.mrf.mxu1 }
 0x10b   : > { %739 = vst [vmem:[%s1240_s7 + $0x70] sm:$0xff] %v723_v22  ;;  %v721_v26 = vadd.f32 %v1235_v34, %v688_v23  ;;  %v699_v27 = vadd.f32 %v1039_v25, %v1007_v24  ;;  %v497_v28 = vpop.f32.mrf.mxu0 }
 0x10c   : > { %v690_v29 = vpop.f32.mrf.mxu1 }
 0x10d   : > { %737 = vst [vmem:[%s1240_s7 + $0x60] sm:$0xff] %v721_v26  ;;  %v724_v30 = vadd.f32 %v1235_v34, %v699_v27  ;;  %v691_v31 = vadd.f32 %v690_v29, %v497_v28 }
 0x10f   : > { %740 = vst [vmem:[%s1240_s7 + $0x78] sm:$0xff] %v724_v30  ;;  %v722_v32 = vadd.f32 %v1235_v34, %v691_v31 }
 0x111   : > { %738 = vst [vmem:[%s1240_s7 + $0x68] sm:$0xff] %v722_v32 }
 0x112 PF: > { %s13_s14 = sadd.s32 1, %s1119_s14   ;;  %s1287_s12 = smov %s1115_s13 }
 0x113   : > { %p10_p5 = scmp.ge.s32.totalorder %s13_s14, 4   ;;  %s1288_s13 = smov %s1290_s15 }
 0x115   :  { %12 = sbr.rel (!%p10_p5) target bundleno = 2 (0x2), region = 71 }

</bundles_post_ra>
